<compile_context>
chip_gen: v7x
topology: tpu7x:2x2x1
jax: 0.10.0
libtpu: 0.0.40
codegen_flags: <defaults>
</compile_context>

<pallas_src>
import functools

import jax
import jax.numpy as jnp
from jax import lax
from jax.experimental import pallas as pl
from jax.experimental.pallas import tpu as pltpu


def _round_up(a, b):
    return -(-a // b) * b


# ----------------------------------------------------------------------------
# Pallas kernel: fused direct conv (single K=KH*KW*C GEMM) + folded-BN + ReLU
# ----------------------------------------------------------------------------
def _conv_bn_relu_kernel(x_ref, w_ref, b_ref, o_ref, patch_ref,
                         *, KH, KW, W, C, Mpad):
    """One batch image per grid step.

    x_ref:     (C, Lpad)        image, spatial flattened as h*W + w, zero
                                right-padded so every shifted window is in-bounds
    w_ref:     (OCp, KH*KW*C)   BN-scale-folded weights, K index = (kh*KW+kw)*C + c
    b_ref:     (OCp, 1)         folded bias, f32
    o_ref:     (OCp, Mpad)      full-resolution output (invalid border columns
                                and lane padding are cropped in the wrapper)
    patch_ref: (KH*KW*C, Mpad)  VMEM scratch: sublane-stacked shifted windows
    """
    # Build the patch slab once: KH*KW static lane-offset slices of the
    # resident image block, stacked along sublanes.
    for kh in range(KH):
        for kw in range(KW):
            s = kh * W + kw                       # static lane shift
            r = (kh * KW + kw) * C                # static sublane offset
            patch_ref[r:r + C, :] = x_ref[:, s:s + Mpad]

    # Single GEMM; accumulation happens inside the MXU (f32 accumulate).
    y = jnp.dot(w_ref[...], patch_ref[...], preferred_element_type=jnp.float32)
    y = y + b_ref[...]                            # f32 epilogue (VPU, also v5e-safe)
    o_ref[...] = jnp.maximum(y, 0.0).astype(o_ref.dtype)


# ----------------------------------------------------------------------------
# BasicConv forward (NCHW in / NCHW out, matching the PyTorch module)
# ----------------------------------------------------------------------------
def basic_conv_forward(x_nchw, conv_w, conv_b, bn_gamma, bn_beta,
                       bn_mean, bn_var, *, eps=1e-5,
                       compute_dtype=jnp.bfloat16, out_dtype=jnp.float32):
    """x_nchw: (N, C, H, W). conv_w: (OC, IC, KH, KW). conv_b: (OC,)."""
    N, C, H, W = x_nchw.shape
    OC, IC, KH, KW = conv_w.shape
    assert IC == C
    OH, OW = H - KH + 1, W - KW + 1              # stride=1, padding=0

    # ---- fold BatchNorm (eval mode) into the weights + a single bias -----
    inv_std = 1.0 / jnp.sqrt(bn_var + eps)
    scale = bn_gamma * inv_std                                  # (OC,)
    w_folded = conv_w * scale[:, None, None, None]              # (OC, C, KH, KW)
    b_folded = (conv_b - bn_mean) * scale + bn_beta             # (OC,)

    # ---- pad OC to a multiple of 8 (sublane alignment) -------------------
    OCp = _round_up(OC, 8)
    if OCp != OC:
        w_folded = jnp.pad(w_folded, ((0, OCp - OC), (0, 0), (0, 0), (0, 0)))
        b_folded = jnp.pad(b_folded, ((0, OCp - OC),))

    # weights -> single (OCp, KH*KW*C) slab; K index = (kh*KW+kw)*C + c,
    # matching the in-kernel patch slab ordering.  bias -> (OCp, 1) f32.
    K = KH * KW * C
    wk = jnp.transpose(w_folded, (0, 2, 3, 1)).reshape(OCp, K).astype(compute_dtype)
    bias = b_folded.reshape(OCp, 1).astype(jnp.float32)

    # ---- flatten spatial; lane-align output; pad input for shifted reads --
    Mout = H * W
    Mpad = _round_up(Mout, 128)                  # unmasked lane-dense stores
    shift_max = (KH - 1) * W + (KW - 1)
    Lpad = _round_up(Mpad + shift_max, 128)
    x_flat = x_nchw.reshape(N, C, Mout)
    # TODO(synk): at production sizes keep activations in compute_dtype between
    # layers and fold this pad into the producer (extra HBM pass otherwise).
    x_flat = jnp.pad(x_flat, ((0, 0), (0, 0), (0, Lpad - Mout)))
    x_flat = x_flat.astype(compute_dtype)

    kernel = functools.partial(_conv_bn_relu_kernel,
                               KH=KH, KW=KW, W=W, C=C, Mpad=Mpad)

    out_full = pl.pallas_call(
        kernel,
        out_shape=jax.ShapeDtypeStruct((N, OCp, Mpad), out_dtype),
        grid_spec=pltpu.PrefetchScalarGridSpec(
            num_scalar_prefetch=0,
            grid=(N,),                           # >=2 parallel blocks: v7x megacore
            in_specs=[
                pl.BlockSpec((None, C, Lpad), lambda n: (n, 0, 0)),
                pl.BlockSpec((OCp, K), lambda n: (0, 0)),
                pl.BlockSpec((OCp, 1), lambda n: (0, 0)),
            ],
            out_specs=pl.BlockSpec((None, OCp, Mpad), lambda n: (n, 0, 0)),
            scratch_shapes=[pltpu.VMEM((K, Mpad), compute_dtype)],
        ),
        compiler_params=pltpu.CompilerParams(
            dimension_semantics=("parallel",),
            vmem_limit_bytes=32 * 1024 * 1024,
        ),
    )(x_flat, wk, bias)

    # Full-resolution output: crop lane padding + garbage right/bottom border,
    # reshape straight to NCHW (no transpose).
    # TODO(synk): at production sizes, keep the (OCp, H*W) slab as the
    # inter-layer format and fuse this crop into the consumer.
    out = out_full[:, :OC, :Mout].reshape(N, OC, H, W)[:, :, :OH, :OW]
    return out


# ----------------------------------------------------------------------------
# Reference (plain JAX) for a sanity check
# ----------------------------------------------------------------------------
def basic_conv_reference(x, conv_w, conv_b, gamma, beta, mean, var, eps=1e-5):
    y = lax.conv_general_dilated(
        x, conv_w, window_strides=(1, 1), padding="VALID",
        dimension_numbers=("NCHW", "OIHW", "NCHW"))
    y = y + conv_b.reshape(1, -1, 1, 1)
    y = (y - mean.reshape(1, -1, 1, 1)) / jnp.sqrt(var.reshape(1, -1, 1, 1) + eps)
    y = y * gamma.reshape(1, -1, 1, 1) + beta.reshape(1, -1, 1, 1)
    return jnp.maximum(y, 0.0)


if __name__ == "__main__":
    # BasicConv(input_channels=4, output_channels=8, kernel_size=3)
    IC, OC, KS = 4, 8, 3
    N, H, W = 2, 16, 16

    key = jax.random.PRNGKey(0)
    kx, kw, kb = jax.random.split(key, 3)

    x = jax.random.normal(kx, (N, IC, H, W), dtype=jnp.float32)

    # Deterministic synthetic parameters (not loaded from a checkpoint).
    fan_in = IC * KS * KS
    conv_w = jax.random.normal(kw, (OC, IC, KS, KS), jnp.float32) / jnp.sqrt(fan_in)
    conv_b = jax.random.normal(kb, (OC,), jnp.float32) * 0.1

    bn_gamma = jnp.ones((OC,), jnp.float32)       # nn.BatchNorm2d defaults
    bn_beta = jnp.zeros((OC,), jnp.float32)
    bn_mean = jnp.zeros((OC,), jnp.float32)
    bn_var = jnp.ones((OC,), jnp.float32)

    ref = basic_conv_reference(x, conv_w, conv_b, bn_gamma, bn_beta,
                               bn_mean, bn_var)

    # f32 compute path: tight check of the fused kernel math.
    fwd_f32 = jax.jit(functools.partial(
        basic_conv_forward, eps=1e-5, compute_dtype=jnp.float32))
    out_f32 = jax.block_until_ready(
        fwd_f32(x, conv_w, conv_b, bn_gamma, bn_beta, bn_mean, bn_var))

    # bf16 compute path (default): halved HBM/VMEM traffic, native MXU dtype.
    fwd_bf16 = jax.jit(functools.partial(
        basic_conv_forward, eps=1e-5, compute_dtype=jnp.bfloat16))
    out_bf16 = jax.block_until_ready(
        fwd_bf16(x, conv_w, conv_b, bn_gamma, bn_beta, bn_mean, bn_var))

    assert out_f32.shape == (N, OC, H - KS + 1, W - KS + 1), out_f32.shape
    assert out_bf16.shape == out_f32.shape, out_bf16.shape
    assert jnp.allclose(out_f32, ref, atol=1e-4, rtol=1e-4), \
        float(jnp.max(jnp.abs(out_f32 - ref)))
    assert jnp.allclose(out_bf16, ref, atol=5e-2, rtol=5e-2), \
        float(jnp.max(jnp.abs(out_bf16 - ref)))

    print("KERNEL_OK")
</pallas_src>

<mosaic_0001>
module attributes {stable_mosaic.version = 11 : i64} {
  func.func @_conv_bn_relu_kernel(%arg0: i32, %arg1: memref<1x4x384xf32, #tpu.memory_space<vmem>>, %arg2: memref<8x36xf32, #tpu.memory_space<vmem>>, %arg3: memref<8x1xf32, #tpu.memory_space<vmem>>, %arg4: memref<1x8x256xf32, #tpu.memory_space<vmem>>, %arg5: memref<36x256xf32, #tpu.memory_space<vmem>>) attributes {dimension_semantics = [#tpu.dimension_semantics<parallel>], iteration_bounds = array<i64: 2>, scalar_prefetch = 0 : i64, scratch_operands = 1 : i64, tpu.core_type = #tpu.core_type<tc>, window_params = [{transform_indices = @transform_0, window_bounds = array<i64: 1, 4, 384>}, {pipeline_mode = #tpu.pipeline_mode<synchronous>, transform_indices = @transform_1, window_bounds = array<i64: 8, 36>}, {pipeline_mode = #tpu.pipeline_mode<synchronous>, transform_indices = @transform_2, window_bounds = array<i64: 8, 1>}, {transform_indices = @transform_3, window_bounds = array<i64: 1, 8, 256>}]} {
    %c0 = arith.constant 0 : index
    %c0_0 = arith.constant 0 : index
    %c0_1 = arith.constant 0 : index
    %0 = vector.load %arg1[%c0, %c0_0, %c0_1] : memref<1x4x384xf32, #tpu.memory_space<vmem>>, vector<1x4x256xf32>
    %1 = vector.shape_cast %0 : vector<1x4x256xf32> to vector<4x256xf32>
    %c0_2 = arith.constant 0 : index
    %c0_3 = arith.constant 0 : index
    %2 = vector.load %arg5[%c0_2, %c0_3] : memref<36x256xf32, #tpu.memory_space<vmem>>, vector<4x256xf32>
    tpu.vector_store %arg5[%c0_2, %c0_3], %1 {strides = array<i32>} : memref<36x256xf32, #tpu.memory_space<vmem>>, vector<4x256xf32>,
    %c0_4 = arith.constant 0 : index
    %c0_5 = arith.constant 0 : index
    %c1 = arith.constant 1 : index
    %3 = vector.load %arg1[%c0_4, %c0_5, %c1] : memref<1x4x384xf32, #tpu.memory_space<vmem>>, vector<1x4x256xf32>
    %4 = vector.shape_cast %3 : vector<1x4x256xf32> to vector<4x256xf32>
    %c4 = arith.constant 4 : index
    %c0_6 = arith.constant 0 : index
    %5 = vector.load %arg5[%c4, %c0_6] : memref<36x256xf32, #tpu.memory_space<vmem>>, vector<4x256xf32>
    tpu.vector_store %arg5[%c4, %c0_6], %4 {strides = array<i32>} : memref<36x256xf32, #tpu.memory_space<vmem>>, vector<4x256xf32>,
    %c0_7 = arith.constant 0 : index
    %c0_8 = arith.constant 0 : index
    %c2 = arith.constant 2 : index
    %6 = vector.load %arg1[%c0_7, %c0_8, %c2] : memref<1x4x384xf32, #tpu.memory_space<vmem>>, vector<1x4x256xf32>
    %7 = vector.shape_cast %6 : vector<1x4x256xf32> to vector<4x256xf32>
    %c8 = arith.constant 8 : index
    %c0_9 = arith.constant 0 : index
    %8 = vector.load %arg5[%c8, %c0_9] : memref<36x256xf32, #tpu.memory_space<vmem>>, vector<4x256xf32>
    tpu.vector_store %arg5[%c8, %c0_9], %7 {strides = array<i32>} : memref<36x256xf32, #tpu.memory_space<vmem>>, vector<4x256xf32>,
    %c0_10 = arith.constant 0 : index
    %c0_11 = arith.constant 0 : index
    %c16 = arith.constant 16 : index
    %9 = vector.load %arg1[%c0_10, %c0_11, %c16] : memref<1x4x384xf32, #tpu.memory_space<vmem>>, vector<1x4x256xf32>
    %10 = vector.shape_cast %9 : vector<1x4x256xf32> to vector<4x256xf32>
    %c12 = arith.constant 12 : index
    %c0_12 = arith.constant 0 : index
    %11 = vector.load %arg5[%c12, %c0_12] : memref<36x256xf32, #tpu.memory_space<vmem>>, vector<4x256xf32>
    tpu.vector_store %arg5[%c12, %c0_12], %10 {strides = array<i32>} : memref<36x256xf32, #tpu.memory_space<vmem>>, vector<4x256xf32>,
    %c0_13 = arith.constant 0 : index
    %c0_14 = arith.constant 0 : index
    %c17 = arith.constant 17 : index
    %12 = vector.load %arg1[%c0_13, %c0_14, %c17] : memref<1x4x384xf32, #tpu.memory_space<vmem>>, vector<1x4x256xf32>
    %13 = vector.shape_cast %12 : vector<1x4x256xf32> to vector<4x256xf32>
    %c16_15 = arith.constant 16 : index
    %c0_16 = arith.constant 0 : index
    %14 = vector.load %arg5[%c16_15, %c0_16] : memref<36x256xf32, #tpu.memory_space<vmem>>, vector<4x256xf32>
    tpu.vector_store %arg5[%c16_15, %c0_16], %13 {strides = array<i32>} : memref<36x256xf32, #tpu.memory_space<vmem>>, vector<4x256xf32>,
    %c0_17 = arith.constant 0 : index
    %c0_18 = arith.constant 0 : index
    %c18 = arith.constant 18 : index
    %15 = vector.load %arg1[%c0_17, %c0_18, %c18] : memref<1x4x384xf32, #tpu.memory_space<vmem>>, vector<1x4x256xf32>
    %16 = vector.shape_cast %15 : vector<1x4x256xf32> to vector<4x256xf32>
    %c20 = arith.constant 20 : index
    %c0_19 = arith.constant 0 : index
    %17 = vector.load %arg5[%c20, %c0_19] : memref<36x256xf32, #tpu.memory_space<vmem>>, vector<4x256xf32>
    tpu.vector_store %arg5[%c20, %c0_19], %16 {strides = array<i32>} : memref<36x256xf32, #tpu.memory_space<vmem>>, vector<4x256xf32>,
    %c0_20 = arith.constant 0 : index
    %c0_21 = arith.constant 0 : index
    %c32 = arith.constant 32 : index
    %18 = vector.load %arg1[%c0_20, %c0_21, %c32] : memref<1x4x384xf32, #tpu.memory_space<vmem>>, vector<1x4x256xf32>
    %19 = vector.shape_cast %18 : vector<1x4x256xf32> to vector<4x256xf32>
    %c24 = arith.constant 24 : index
    %c0_22 = arith.constant 0 : index
    %20 = vector.load %arg5[%c24, %c0_22] : memref<36x256xf32, #tpu.memory_space<vmem>>, vector<4x256xf32>
    tpu.vector_store %arg5[%c24, %c0_22], %19 {strides = array<i32>} : memref<36x256xf32, #tpu.memory_space<vmem>>, vector<4x256xf32>,
    %c0_23 = arith.constant 0 : index
    %c0_24 = arith.constant 0 : index
    %c33 = arith.constant 33 : index
    %21 = vector.load %arg1[%c0_23, %c0_24, %c33] : memref<1x4x384xf32, #tpu.memory_space<vmem>>, vector<1x4x256xf32>
    %22 = vector.shape_cast %21 : vector<1x4x256xf32> to vector<4x256xf32>
    %c28 = arith.constant 28 : index
    %c0_25 = arith.constant 0 : index
    %23 = vector.load %arg5[%c28, %c0_25] : memref<36x256xf32, #tpu.memory_space<vmem>>, vector<4x256xf32>
    tpu.vector_store %arg5[%c28, %c0_25], %22 {strides = array<i32>} : memref<36x256xf32, #tpu.memory_space<vmem>>, vector<4x256xf32>,
    %c0_26 = arith.constant 0 : index
    %c0_27 = arith.constant 0 : index
    %c34 = arith.constant 34 : index
    %24 = vector.load %arg1[%c0_26, %c0_27, %c34] : memref<1x4x384xf32, #tpu.memory_space<vmem>>, vector<1x4x256xf32>
    %25 = vector.shape_cast %24 : vector<1x4x256xf32> to vector<4x256xf32>
    %c32_28 = arith.constant 32 : index
    %c0_29 = arith.constant 0 : index
    %26 = vector.load %arg5[%c32_28, %c0_29] : memref<36x256xf32, #tpu.memory_space<vmem>>, vector<4x256xf32>
    tpu.vector_store %arg5[%c32_28, %c0_29], %25 {strides = array<i32>} : memref<36x256xf32, #tpu.memory_space<vmem>>, vector<4x256xf32>,
    %c0_30 = arith.constant 0 : index
    %c0_31 = arith.constant 0 : index
    %27 = vector.load %arg2[%c0_30, %c0_31] : memref<8x36xf32, #tpu.memory_space<vmem>>, vector<8x36xf32>
    %c0_32 = arith.constant 0 : index
    %c0_33 = arith.constant 0 : index
    %28 = vector.load %arg5[%c0_32, %c0_33] : memref<36x256xf32, #tpu.memory_space<vmem>>, vector<36x256xf32>
    %cst = arith.constant dense<0.000000e+00> : vector<8x256xf32>
    %29 = tpu.matmul %27, %28, %cst {dimension_numbers = #tpu.dot_dimension_numbers<[1], [0], [0], [1], [0, 0, 1, 1], [], []>} : vector<8x36xf32>, vector<36x256xf32>, vector<8x256xf32> -> vector<8x256xf32>
    %c0_34 = arith.constant 0 : index
    %c0_35 = arith.constant 0 : index
    %30 = vector.load %arg3[%c0_34, %c0_35] : memref<8x1xf32, #tpu.memory_space<vmem>>, vector<8x1xf32>
    %31 = vector.broadcast %30 : vector<8x1xf32> to vector<8x256xf32>
    %32 = arith.addf %29, %31 : vector<8x256xf32>
    %cst_36 = arith.constant 0.000000e+00 : f32
    %33 = vector.broadcast %cst_36 : f32 to vector<8x256xf32>
    %34 = arith.maximumf %32, %33 : vector<8x256xf32>
    %c0_37 = arith.constant 0 : index
    %c0_38 = arith.constant 0 : index
    %c0_39 = arith.constant 0 : index
    %35 = vector.load %arg4[%c0_37, %c0_38, %c0_39] : memref<1x8x256xf32, #tpu.memory_space<vmem>>, vector<1x8x256xf32>
    %36 = vector.shape_cast %35 : vector<1x8x256xf32> to vector<8x256xf32>
    %37 = vector.shape_cast %34 : vector<8x256xf32> to vector<1x8x256xf32>
    tpu.vector_store %arg4[%c0_37, %c0_38, %c0_39], %37 {strides = array<i32>} : memref<1x8x256xf32, #tpu.memory_space<vmem>>, vector<1x8x256xf32>,
    return
  }
  func.func @transform_0(%arg0: i32) -> (i32, i32, i32) {
    %c0_i32 = arith.constant 0 : i32
    %c0_i32_0 = arith.constant 0 : i32
    %c0_i32_1 = arith.constant 0 : i32
    return %arg0, %c0_i32, %c0_i32_0 : i32, i32, i32
  }
  func.func @transform_1(%arg0: i32) -> (i32, i32) {
    %c0_i32 = arith.constant 0 : i32
    %c0_i32_0 = arith.constant 0 : i32
    %c0_i32_1 = arith.constant 0 : i32
    return %c0_i32, %c0_i32_0 : i32, i32
  }
  func.func @transform_2(%arg0: i32) -> (i32, i32) {
    %c0_i32 = arith.constant 0 : i32
    %c0_i32_0 = arith.constant 0 : i32
    %c0_i32_1 = arith.constant 0 : i32
    return %c0_i32, %c0_i32_0 : i32, i32
  }
  func.func @transform_3(%arg0: i32) -> (i32, i32, i32) {
    %c0_i32 = arith.constant 0 : i32
    %c0_i32_0 = arith.constant 0 : i32
    %c0_i32_1 = arith.constant 0 : i32
    return %arg0, %c0_i32, %c0_i32_0 : i32, i32, i32
  }
}

</mosaic_0001>

<bundles_post_ra>
// kernel: basic_conv_forward.1
= control target key start
LH: loop header
LB: loop body
LE: loop exit
PB: predicated region body
PF: predicated region fallthrough
CT: control target
= control target key end

     0   :  { %s569_s12 = smov 0   ;;  %s615_s0 = inlined_call_operand.vmem [shape: f32[2,4,384], index: 0, kind: input, shape index: {}]   ;;  %s616_s1 = inlined_call_operand.vmem [shape: f32[8,36], index: 1, kind: input, shape index: {}]   ;;  %s617_s2 = inlined_call_operand.vmem [shape: f32[8,1], index: 2, kind: input, shape index: {}]   ;;  %s618_s3 = inlined_call_operand.vmem [shape: f32[2,8,256], index: 3, kind: output, shape index: {}]  }
   0x1 LB: > { %s483_s13 = sadd.s32 4294967295, %s537_s12   ;;  %p487_p0 = scmp.ge.s32.totalorder %s537_s12, 1  ;;  %s537_s12 = sphi %s569_s12, %s13_s12  }
   0x2   : > { %p137_p1 = scmp.lt.s32.totalorder %s537_s12, 3 }
   0x4   : > { %p138_p2 = pnand %p487_p0, %p137_p1 }
   0x5   : > { %p161_p3 = scmp.lt.s32.totalorder (!%p138_p2), %s483_s13, 1  ;;  %s539_s18 = smov (!%p138_p2), 126   ;;  %v547_v11 = vmov (!%p138_p2), 0.0   ;;  %v548_v12 = vmov (!%p138_p2), 0   ;;  %v336_v13 = vld [vmem:[%s617_s2] sm:$0xff] (!%p138_p2)  ;;  %vm207_vm0 = vcmask (!%p138_p2), 1031168  }
   0x6   : > { %141 = sbr.rel (%p138_p2) target bundleno = 407 (0x197), region = 32  ;;  %s540_s19 = smov (!%p138_p2), 127   ;;  %417 = vmatprep.mubr.f32.mxu0 (!%p138_p2), %v547_v11  ;;  %524 = vset.pattern.permute.xlu0 (!%p138_p2), %v548_v12  ;;  %vm226_vm1 = vcmask (!%p138_p2), 916480   ;;  %vm189_vm2 = vcmask (!%p138_p2), 1039360   ;;  %vm244_vm3 = vcmask (!%p138_p2), 908288   ;;  %vm263_vm4 = vcmask (!%p138_p2), 900096  }
   0x7   : > { %s541_s20 = smov (!%p138_p2), 112   ;;  %s542_s21 = smov (!%p138_p2), 111   ;;  %vm281_vm5 = vcmask (!%p138_p2), 785408   ;;  %vm300_vm6 = vcmask (!%p138_p2), 777216   ;;  %vm318_vm7 = vcmask (!%p138_p2), 769024   ;;  %vm346_vm8 = vcmask (!%p138_p2), 1043456  }
   0x8   : > { %s543_s22 = smov (!%p138_p2), 110   ;;  %s544_s23 = smov (!%p138_p2), 96   ;;  %vm342_vm9 = vcmask (!%p138_p2), 293888  }
   0x9   : > { %s545_s24 = smov (!%p138_p2), 95   ;;  %s546_s25 = smov (!%p138_p2), 94  }
   0xd   : > { %s620_s13 = smov (!%p161_p3, %s483_s13), 1 }
   0xe   : > { %s505_s14 = smul.u32 12, %s620_s13  ;;  %s496_s30 = sshll.u32 %s620_s13, 4 }
   0xf   : > { %s170_s6 = scalar_lea.vmem %s618_s3, %s496_s30 }
  0x10   : > { %s583_s17 = scalar_lea.vmem %s615_s0, %s505_s14 }
  0x11   : > { %v197_v0 = vld [vmem:[%s583_s17 + $0x8] sm:$0xf]  ;;  %v177_v1 = vld [vmem:[%s583_s17] sm:$0xff] }
  0x12   : > { %205 = vrot.lane.b32.xlu1 %v197_v0, %s539_s18  ;;  %185 = vrot.lane.b32.xlu0 %v177_v1, %s540_s19  ;;  %v200_v2 = vcombine.high %v177_v1, %v177_v1  ;;  %175 = vst [vmem:[#allocation2] sm:$0xf] %v177_v1  ;;  %v527_v3 = vld [vmem:[%s583_s17 + $0x8] ss:$0 sps:$4 sm:$0xff]   ;;  %v181_v5 = vcombine.low %v177_v1, %v177_v1 }
  0x13   : > { %v528_v4 = vld [vmem:[%s583_s17 + $0x8] ss:$0 sps:$4 sm:$0xff]  }
  0x14   : > { %176 = vst [vmem:[#allocation2 + $0x8] sm:$0xf] %v200_v2  ;;  %v234_v6 = vld [vmem:[%s583_s17 + $0x8] sm:$0xf] }
  0x15   : > { %v529_v7 = vld [vmem:[%s583_s17 + $0x8] ss:$0 sps:$4 sm:$0xff]  }
  0x16   : > { %203 = vrot.lane.b32.xlu1 %v200_v2, %s539_s18  ;;  %222 = vrot.lane.b32.xlu0 %v177_v1, %s541_s20  ;;  %v271_v8 = vld [vmem:[%s583_s17 + $0x8] sm:$0xf] }
  0x17   : > { %v530_v9 = vld [vmem:[%s583_s17 + $0x8] ss:$0 sps:$4 sm:$0xff]  }
  0x18   : > { %v308_v10 = vld [vmem:[%s583_s17 + $0x8] sm:$0xf] }
  0x1a   : > { %224 = vrot.lane.b32.xlu1 %v527_v3, %s541_s20  ;;  %187 = vrot.lane.b32.xlu0 %v528_v4, %s540_s19  ;;  %v325_v3 = vld [vmem:[%s616_s1] sm:$0xff] }
  0x1e   : > { %201 = vrot.lane.b32.xlu1 %v177_v1, %s539_s18  ;;  %183 = vrot.lane.b32.xlu0 %v181_v5, %s540_s19 }
  0x22   : > { %240 = vrot.lane.b32.xlu1 %v200_v2, %s542_s21  ;;  %220 = vrot.lane.b32.xlu0 %v181_v5, %s541_s20 }
  0x26   : > { %259 = vrot.lane.b32.xlu1 %v177_v1, %s543_s22  ;;  %242 = vrot.lane.b32.xlu0 %v234_v6, %s542_s21 }
  0x2a   : > { %277 = vrot.lane.b32.xlu1 %v200_v2, %s544_s23  ;;  %261 = vrot.lane.b32.xlu0 %v529_v7, %s543_s22 }
  0x2e   : > { %296 = vrot.lane.b32.xlu1 %v177_v1, %s545_s24  ;;  %279 = vrot.lane.b32.xlu0 %v271_v8, %s544_s23 }
  0x32   : > { %238 = vrot.lane.b32.xlu1 %v177_v1, %s542_s21  ;;  %298 = vrot.lane.b32.xlu0 %v530_v9, %s545_s24 }
  0x36   : > { %275 = vrot.lane.b32.xlu1 %v177_v1, %s544_s23  ;;  %257 = vrot.lane.b32.xlu0 %v181_v5, %s543_s22 }
  0x3a   : > { %314 = vrot.lane.b32.xlu1 %v200_v2, %s546_s25  ;;  %294 = vrot.lane.b32.xlu0 %v181_v5, %s545_s24 }
  0x3e   : > { %312 = vrot.lane.b32.xlu1 %v177_v1, %s546_s25  ;;  %316 = vrot.lane.b32.xlu0 %v308_v10, %s546_s25 }
  0x42   : > { %339 = vperm.xlu0 %524, %v336_v13  }
  0x84   : > { %v206_v14 = vpop.permute.xlu1 %205  ;;  %v186_v15 = vpop.permute.xlu0 %185 }
  0x88   : > { %v204_v16 = vpop.permute.xlu1 %203  ;;  %v223_v17 = vpop.permute.xlu0 %222 }
  0x89   : > { %v209_v18 = vsel %vm207_vm0, %v204_v16, %v206_v14 }
  0x8a   : > { %213 = vst [vmem:[#allocation2 + $0x18] sm:$0xf] %v209_v18 }
  0x8c   : > { %v225_v19 = vpop.permute.xlu1 %224  ;;  %v188_v20 = vpop.permute.xlu0 %187 }
  0x8d   : > { %v228_v21 = vsel %vm226_vm1, %v223_v17, %v225_v19  ;;  %v191_v22 = vsel %vm189_vm2, %v186_v15, %v188_v20 }
  0x8e   : > { %232 = vst [vmem:[#allocation2 + $0x18] sm:$0xf0] %v228_v21  ;;  %195 = vst [vmem:[#allocation2 + $0x8] sm:$0xf0] %v191_v22 }
  0x90   : > { %v202_v23 = vpop.permute.xlu1 %201  ;;  %v184_v24 = vpop.permute.xlu0 %183 }
  0x91   : > { %v208_v25 = vsel %vm207_vm0, %v202_v23, %v204_v16  ;;  %v190_v26 = vsel %vm189_vm2, %v184_v24, %v186_v15 }
  0x92   : > { %212 = vst [vmem:[#allocation2 + $0x10] sm:$0xf] %v208_v25  ;;  %194 = vst [vmem:[#allocation2] sm:$0xf0] %v190_v26 }
  0x94   : > { %v241_v27 = vpop.permute.xlu1 %240  ;;  %v221_v28 = vpop.permute.xlu0 %220 }
  0x95   : > { %v227_v29 = vsel %vm226_vm1, %v221_v28, %v223_v17  ;;  %v327_v30 = vld [vmem:[#allocation2 + $0x8] sm:$0xff]  ;;  %v329_v31 = vld [vmem:[#allocation2 + $0x18] sm:$0xff] }
  0x96   : > { %231 = vst [vmem:[#allocation2 + $0x10] sm:$0xf0] %v227_v29  ;;  %v497_v32 = vpack.c.bf16 %v329_v31, %v327_v30 }
  0x98   : > { %v260_v33 = vpop.permute.xlu1 %259  ;;  %v243_v34 = vpop.permute.xlu0 %242  ;;  %498 = vmatprep.subr.bf16.mxu0 %v497_v32 }
  0x99   : > { %v246_v35 = vsel %vm244_vm3, %v241_v27, %v243_v34  ;;  %v326_v39 = vld [vmem:[#allocation2] sm:$0xff] }
  0x9a   : > { %250 = vst [vmem:[#allocation2 + $0x28] sm:$0xf] %v246_v35 }
  0x9c   : > { %v278_v36 = vpop.permute.xlu1 %277  ;;  %v262_v37 = vpop.permute.xlu0 %261 }
  0x9d   : > { %v265_v38 = vsel %vm263_vm4, %v260_v33, %v262_v37  ;;  %v328_v40 = vld [vmem:[#allocation2 + $0x10] sm:$0xff] }
  0x9e   : > { %269 = vst [vmem:[#allocation2 + $0x28] sm:$0xf0] %v265_v38  ;;  %v499_v41 = vpack.c.bf16 %v328_v40, %v326_v39 }
  0xa0   : > { %v297_v42 = vpop.permute.xlu1 %296  ;;  %v280_v43 = vpop.permute.xlu0 %279  ;;  %500 = vmatpush1.bf16.msra.mxu0 %v499_v41 }
  0xa1   : > { %v283_v44 = vsel %vm281_vm5, %v278_v36, %v280_v43 }
  0xa2   : > { %287 = vst [vmem:[#allocation2 + $0x38] sm:$0xf] %v283_v44 }
  0xa4   : > { %v239_v45 = vpop.permute.xlu1 %238  ;;  %v299_v46 = vpop.permute.xlu0 %298 }
  0xa5   : > { %v245_v47 = vsel %vm244_vm3, %v239_v45, %v241_v27  ;;  %v302_v48 = vsel %vm300_vm6, %v297_v42, %v299_v46  ;;  %v331_v56 = vld [vmem:[#allocation2 + $0x28] sm:$0xff] }
  0xa6   : > { %249 = vst [vmem:[#allocation2 + $0x20] sm:$0xf] %v245_v47  ;;  %306 = vst [vmem:[#allocation2 + $0x38] sm:$0xf0] %v302_v48 }
  0xa8   : > { %v276_v49 = vpop.permute.xlu1 %275  ;;  %v258_v50 = vpop.permute.xlu0 %257 }
  0xa9   : > { %v282_v51 = vsel %vm281_vm5, %v276_v49, %v278_v36  ;;  %v264_v52 = vsel %vm263_vm4, %v258_v50, %v260_v33 }
  0xaa   : > { %286 = vst [vmem:[#allocation2 + $0x30] sm:$0xf] %v282_v51  ;;  %268 = vst [vmem:[#allocation2 + $0x20] sm:$0xf0] %v264_v52 }
  0xac   : > { %v315_v53 = vpop.permute.xlu1 %314  ;;  %v295_v54 = vpop.permute.xlu0 %294 }
  0xad   : > { %v301_v55 = vsel %vm300_vm6, %v295_v54, %v297_v42  ;;  %v333_v57 = vld [vmem:[#allocation2 + $0x38] sm:$0xff] }
  0xae   : > { %305 = vst [vmem:[#allocation2 + $0x30] sm:$0xf0] %v301_v55  ;;  %v501_v58 = vpack.c.bf16 %v333_v57, %v331_v56 }
  0xb0   : > { %v313_v59 = vpop.permute.xlu1 %312  ;;  %v317_v60 = vpop.permute.xlu0 %316  ;;  %502 = vmatprep.subr.bf16.mxu0 %v501_v58 }
  0xb1   : > { %v319_v61 = vsel %vm318_vm7, %v313_v59, %v315_v53  ;;  %v320_v62 = vsel %vm318_vm7, %v315_v53, %v317_v60  ;;  %v330_v63 = vld [vmem:[#allocation2 + $0x20] sm:$0xff] }
  0xb2   : > { %323 = vst [vmem:[#allocation2 + $0x40] sm:$0xf] %v319_v61  ;;  %324 = vst [vmem:[#allocation2 + $0x48] sm:$0xf] %v320_v62 }
  0xb5   : > { %v332_v0 = vld [vmem:[#allocation2 + $0x30] sm:$0xff] }
  0xb6   : > { %v503_v1 = vpack.c.bf16 %v332_v0, %v330_v63 }
  0xb8   : > { %504 = vmatpush1.bf16.msra.mxu0 %v503_v1 }
  0xb9   : > { %v335_v2 = vld [vmem:[#allocation2 + $0x48] sm:$0xf]  ;;  %v334_v4 = vld [vmem:[#allocation2 + $0x40] sm:$0xf] }
  0xba   : > { %491 = vmatprep.subr.msk.mxu0 %vm346_vm8, %v335_v2 }
  0xbc   : > { %492 = vmatpush1.msk.msra.mxu0 %vm346_vm8, %v334_v4 }
  0xbd   : > { %493 = vmatmul.mubr.msk.f32.vlgmr.msra.gmra.mrb[0].mxu0 %vm342_vm9, %v325_v3 }
  0xc1   : > { %v340_v5 = vpop.permute.xlu0 %339 }
 0x190   : > { %v419_v6 = vpop.f32.mrb[0].mxu0 }
 0x191   : > { %v420_v7 = vadd.f32 %v419_v6, %v340_v5  ;;  %v421_v8 = vpop.f32.mrb[1].mxu0 }
 0x192   : > { %v422_v9 = vadd.f32 %v421_v8, %v340_v5 }
 0x193   : > { %v424_v10 = vmax.f32 %v420_v7, 0.0 }
 0x194   : > { %v425_v11 = vmax.f32 %v422_v9, 0.0 }
 0x195   : > { %426 = vst [vmem:[%s170_s6] sm:$0xff] %v424_v10 }
 0x196   : > { %427 = vst [vmem:[%s170_s6 + $0x8] sm:$0xff] %v425_v11 }
 0x197 PF: > { %s13_s12 = sadd.s32 1, %s537_s12  }
 0x198   : > { %p10_p4 = scmp.ge.s32.totalorder %s13_s12, 4  }
 0x19a   :  { %12 = sbr.rel (!%p10_p4) target bundleno = 1 (0x1), region = 62 }

</bundles_post_ra>
